<compile_context>
chip_gen: v7x
topology: tpu7x:2x2x1
jax: 0.10.0
libtpu: 0.0.40
codegen_flags: <defaults>
</compile_context>

<pallas_src>
import functools

import jax
import jax.numpy as jnp
from jax.experimental import pallas as pl
from jax.experimental.pallas import tpu as pltpu


def _round_up(x, m):
    return ((x + m - 1) // m) * m


def _focal_loss_kernel(logits_ref, targets_ref, out_ref, *,
                       gamma, alpha, batch, block_rows, needs_mask):
    """One (TB, C) batch tile -> one masked partial-sum slab.

    logits_ref : (TB, C)  f32 VMEM tile (ragged last tile may hold garbage rows)
    targets_ref: (TB, 1)  i32 VMEM tile
    out_ref    : (8, 128) f32; the tile's partial focal-loss sum lands in [0, 0]
                 and the rest is zero, so the wrapper just sums the whole array.
    """
    logits = logits_ref[...]                                     # (TB, C) f32
    tgt = targets_ref[...]                                       # (TB, 1) i32
    tb, c = logits.shape

    # Numerically stable logsumexp; `shifted` is reused for the target-logit
    # extraction so per-element VALU work stays minimal.
    m = jnp.max(logits, axis=-1, keepdims=True)                  # (TB, 1)
    shifted = logits - m                                         # (TB, C)
    col = jax.lax.broadcasted_iota(jnp.int32, (tb, c), 1)
    tgt_shifted = jnp.sum(jnp.where(col == tgt, shifted, 0.0),
                          axis=-1, keepdims=True)                # (TB, 1)
    sum_exp = jnp.sum(jnp.exp(shifted), axis=-1, keepdims=True)  # (TB, 1)

    # CE = logsumexp(logits) - logits[target] = log(sum_exp) - tgt_shifted.
    ce = jnp.log(sum_exp) - tgt_shifted                          # (TB, 1)
    pt = jnp.exp(-ce)                                            # softmax[target]
    one_minus_pt = 1.0 - pt

    g = float(gamma)
    if g == 2.0:
        mod = one_minus_pt * one_minus_pt      # squaring is sign-safe: no clamp
    elif g == 1.0:
        mod = one_minus_pt
    elif g == 0.0:
        mod = jnp.ones_like(one_minus_pt)
    else:
        # Clamp at 0 so rounding can never feed a negative base to pow.
        mod = jnp.power(jnp.maximum(one_minus_pt, 0.0), jnp.float32(g))

    loss = jnp.float32(alpha) * mod * ce                         # (TB, 1)

    if needs_mask:
        # Ragged last block: rows >= batch contain garbage (no wrapper-side
        # padding) -- zero them before the in-kernel reduction.
        row = (pl.program_id(0) * block_rows
               + jax.lax.broadcasted_iota(jnp.int32, (tb, 1), 0))
        loss = jnp.where(row < batch, loss, 0.0)

    partial = jnp.sum(loss, axis=0, keepdims=True)               # (1, 1)
    r8 = jax.lax.broadcasted_iota(jnp.int32, (8, 128), 0)
    c8 = jax.lax.broadcasted_iota(jnp.int32, (8, 128), 1)
    out_ref[...] = jnp.where((r8 == 0) & (c8 == 0), partial, 0.0)


def focal_loss(logits, targets, *, gamma=2.0, alpha=1.0,
               vmem_working_set_bytes=24 * 1024 * 1024):
    """Mean focal loss over the batch. logits: (B, C) float, targets: (B,) int."""
    B, C = logits.shape
    logits = logits.astype(jnp.float32)
    targets_2d = targets.astype(jnp.int32).reshape(B, 1)

    # Lane-padding-aware VMEM accounting: per row the double-buffered pipeline
    # holds round_up(C,128)*4 bytes of logits plus 128*4 bytes of i32 targets,
    # times 2 pipeline buffers per operand.
    c_pad = _round_up(C, 128)
    bytes_per_row = 2 * (c_pad + 128) * 4
    tb = max(8, (vmem_working_set_bytes // bytes_per_row) // 8 * 8)
    # Never larger than the (rounded-up) batch; keep >= 2 grid tiles for
    # non-tiny B so the "parallel" axis can land on both v7x TensorCores.
    two_tile_cap = max(8, _round_up((B + 1) // 2, 8))
    tb = min(tb, _round_up(B, 8), two_tile_cap)

    num_tiles = pl.cdiv(B, tb)
    needs_mask = (B % tb) != 0

    kernel = functools.partial(_focal_loss_kernel, gamma=gamma, alpha=alpha,
                               batch=B, block_rows=tb, needs_mask=needs_mask)

    partials = pl.pallas_call(
        kernel,
        out_shape=jax.ShapeDtypeStruct((num_tiles * 8, 128), jnp.float32),
        grid=(num_tiles,),
        in_specs=[
            pl.BlockSpec((tb, C), lambda i: (i, 0)),
            pl.BlockSpec((tb, 1), lambda i: (i, 0)),
        ],
        out_specs=pl.BlockSpec((8, 128), lambda i: (i, 0)),
        compiler_params=pltpu.CompilerParams(
            dimension_semantics=("parallel",),   # independent tiles -> 2 TCs on v7x
            vmem_limit_bytes=48 * 1024 * 1024,   # explicit scoped budget (v5e default 16 MiB)
        ),
    )(logits, targets_2d)

    # Tiny (num_tiles*8, 128) reduce; divisor is always the true batch size.
    return jnp.sum(partials) / jnp.float32(B)


def _focal_loss_ref(logits, targets, *, gamma=2.0, alpha=1.0):
    # Pure-JAX reference (mirrors nn.CrossEntropyLoss(reduction='none') + focal).
    logits = logits.astype(jnp.float32)
    lse = jax.nn.logsumexp(logits, axis=-1)
    tgt_logit = jnp.take_along_axis(logits, targets[:, None], axis=-1)[:, 0]
    ce = lse - tgt_logit
    pt = jnp.exp(-ce)
    return jnp.mean(alpha * (1.0 - pt) ** gamma * ce)


if __name__ == "__main__":
    key = jax.random.PRNGKey(0)
    k1, k2, k3, k4, k5, k6 = jax.random.split(key, 6)

    # Small case consistent with the module: (batch, num_classes) logits.
    B, C = 8, 32
    logits = jax.random.normal(k1, (B, C), dtype=jnp.float32)
    targets = jax.random.randint(k2, (B,), 0, C, dtype=jnp.int32)
    out = focal_loss(logits, targets, gamma=2.0, alpha=1.0)
    jax.block_until_ready(out)
    ref = _focal_loss_ref(logits, targets, gamma=2.0, alpha=1.0)
    assert jnp.allclose(out, ref, atol=1e-5, rtol=1e-5), (out, ref)

    # Multi-tile ragged path (B not a multiple of the row tile -> in-kernel mask).
    B2, C2 = 1037, 32
    logits2 = jax.random.normal(k3, (B2, C2), dtype=jnp.float32) * 3.0
    targets2 = jax.random.randint(k4, (B2,), 0, C2, dtype=jnp.int32)
    out2 = focal_loss(logits2, targets2, gamma=2.0, alpha=1.0)
    jax.block_until_ready(out2)
    ref2 = _focal_loss_ref(logits2, targets2, gamma=2.0, alpha=1.0)
    assert jnp.allclose(out2, ref2, atol=1e-5, rtol=1e-5), (out2, ref2)

    # Multi-tile evenly-divisible path (no mask emitted at trace time).
    B3, C3 = 1024, 32
    logits3 = jax.random.normal(k5, (B3, C3), dtype=jnp.float32)
    targets3 = jax.random.randint(k6, (B3,), 0, C3, dtype=jnp.int32)
    out3 = focal_loss(logits3, targets3, gamma=2.0, alpha=1.0)
    jax.block_until_ready(out3)
    ref3 = _focal_loss_ref(logits3, targets3, gamma=2.0, alpha=1.0)
    assert jnp.allclose(out3, ref3, atol=1e-5, rtol=1e-5), (out3, ref3)

    print("KERNEL_OK")
</pallas_src>

<mosaic_0001>
module attributes {stable_mosaic.version = 11 : i64} {
  func.func @_focal_loss_kernel(%arg0: i32, %arg1: memref<8x32xf32, #tpu.memory_space<vmem>>, %arg2: memref<8x1xi32, #tpu.memory_space<vmem>>, %arg3: memref<8x128xf32, #tpu.memory_space<vmem>>) attributes {dimension_semantics = [#tpu.dimension_semantics<parallel>], iteration_bounds = array<i64: 1>, scalar_prefetch = 0 : i64, scratch_operands = 0 : i64, tpu.core_type = #tpu.core_type<tc>, window_params = [{transform_indices = @transform_0, window_bounds = array<i64: 8, 32>}, {transform_indices = @transform_1, window_bounds = array<i64: 8, 1>}, {transform_indices = @transform_2, window_bounds = array<i64: 8, 128>}]} {
    %c0 = arith.constant 0 : index
    %c0_0 = arith.constant 0 : index
    %0 = vector.load %arg1[%c0, %c0_0] : memref<8x32xf32, #tpu.memory_space<vmem>>, vector<8x32xf32>
    %c0_1 = arith.constant 0 : index
    %c0_2 = arith.constant 0 : index
    %1 = vector.load %arg2[%c0_1, %c0_2] : memref<8x1xi32, #tpu.memory_space<vmem>>, vector<8x1xi32>
    %cst = arith.constant dense<0xFF800000> : vector<8xf32>
    %2 = vector.multi_reduction <maximumf>, %0, %cst [1] : vector<8x32xf32> to vector<8xf32>
    %3 = vector.shape_cast %2 : vector<8xf32> to vector<8x1xf32>
    %4 = vector.broadcast %3 : vector<8x1xf32> to vector<8x32xf32>
    %5 = arith.subf %0, %4 : vector<8x32xf32>
    %6 = tpu.iota {dimensions = array<i32: 1>} : vector<8x32xi32>
    %7 = vector.broadcast %1 : vector<8x1xi32> to vector<8x32xi32>
    %8 = arith.cmpi eq, %6, %7 : vector<8x32xi32>
    %cst_3 = arith.constant 0.000000e+00 : f32
    %9 = vector.broadcast %cst_3 : f32 to vector<8x32xf32>
    %10 = arith.select %8, %5, %9 : vector<8x32xi1>, vector<8x32xf32>
    %cst_4 = arith.constant dense<0.000000e+00> : vector<8xf32>
    %11 = vector.multi_reduction <add>, %10, %cst_4 [1] : vector<8x32xf32> to vector<8xf32>
    %12 = vector.shape_cast %11 : vector<8xf32> to vector<8x1xf32>
    %13 = math.exp %5 : vector<8x32xf32>
    %cst_5 = arith.constant dense<0.000000e+00> : vector<8xf32>
    %14 = vector.multi_reduction <add>, %13, %cst_5 [1] : vector<8x32xf32> to vector<8xf32>
    %15 = vector.shape_cast %14 : vector<8xf32> to vector<8x1xf32>
    %16 = math.log %15 : vector<8x1xf32>
    %17 = arith.subf %16, %12 : vector<8x1xf32>
    %cst_6 = arith.constant 0.000000e+00 : f32
    %18 = vector.broadcast %cst_6 : f32 to vector<8x1xf32>
    %19 = arith.subf %18, %17 : vector<8x1xf32>
    %20 = math.exp %19 : vector<8x1xf32>
    %cst_7 = arith.constant 1.000000e+00 : f32
    %21 = vector.broadcast %cst_7 : f32 to vector<8x1xf32>
    %22 = arith.subf %21, %20 : vector<8x1xf32>
    %23 = arith.mulf %22, %22 : vector<8x1xf32>
    %cst_8 = arith.constant 1.000000e+00 : f32
    %24 = vector.broadcast %cst_8 : f32 to vector<8x1xf32>
    %25 = arith.mulf %24, %23 : vector<8x1xf32>
    %26 = arith.mulf %25, %17 : vector<8x1xf32>
    %cst_9 = arith.constant dense<0.000000e+00> : vector<1xf32>
    %27 = vector.multi_reduction <add>, %26, %cst_9 [0] : vector<8x1xf32> to vector<1xf32>
    %28 = vector.shape_cast %27 : vector<1xf32> to vector<1x1xf32>
    %29 = tpu.iota {dimensions = array<i32: 0>} : vector<8x128xi32>
    %30 = tpu.iota {dimensions = array<i32: 1>} : vector<8x128xi32>
    %c0_i32 = arith.constant 0 : i32
    %31 = vector.broadcast %c0_i32 : i32 to vector<8x128xi32>
    %32 = arith.cmpi eq, %29, %31 : vector<8x128xi32>
    %c0_i32_10 = arith.constant 0 : i32
    %33 = vector.broadcast %c0_i32_10 : i32 to vector<8x128xi32>
    %34 = arith.cmpi eq, %30, %33 : vector<8x128xi32>
    %35 = arith.andi %32, %34 : vector<8x128xi1>
    %cst_11 = arith.constant 0.000000e+00 : f32
    %36 = vector.shape_cast %28 : vector<1x1xf32> to vector<1x1xf32>
    %37 = vector.broadcast %36 : vector<1x1xf32> to vector<8x128xf32>
    %38 = vector.broadcast %cst_11 : f32 to vector<8x128xf32>
    %39 = arith.select %35, %37, %38 : vector<8x128xi1>, vector<8x128xf32>
    %c0_12 = arith.constant 0 : index
    %c0_13 = arith.constant 0 : index
    %40 = vector.load %arg3[%c0_12, %c0_13] : memref<8x128xf32, #tpu.memory_space<vmem>>, vector<8x128xf32>
    tpu.vector_store %arg3[%c0_12, %c0_13], %39 {strides = array<i32>} : memref<8x128xf32, #tpu.memory_space<vmem>>, vector<8x128xf32>,
    return
  }
  func.func @transform_0(%arg0: i32) -> (i32, i32) {
    %c0_i32 = arith.constant 0 : i32
    %c0_i32_0 = arith.constant 0 : i32
    return %arg0, %c0_i32 : i32, i32
  }
  func.func @transform_1(%arg0: i32) -> (i32, i32) {
    %c0_i32 = arith.constant 0 : i32
    %c0_i32_0 = arith.constant 0 : i32
    return %arg0, %c0_i32 : i32, i32
  }
  func.func @transform_2(%arg0: i32) -> (i32, i32) {
    %c0_i32 = arith.constant 0 : i32
    %c0_i32_0 = arith.constant 0 : i32
    return %arg0, %c0_i32 : i32, i32
  }
}

</mosaic_0001>

<bundles_post_ra>
// kernel: tpu_custom_call.1
= control target key start
LH: loop header
LB: loop body
LE: loop exit
PB: predicated region body
PF: predicated region fallthrough
CT: control target
= control target key end

     0   :  { %vm14_vm0 = vcmask 261120   ;;  %s141_s0 = inlined_call_operand.vmem [shape: f32[8,32], index: 0, kind: input, shape index: {}]   ;;  %s142_s1 = inlined_call_operand.vmem [shape: s32[8,1], index: 1, kind: input, shape index: {}]   ;;  %s143_s2 = inlined_call_operand.hbm [shape: f32[8,128], index: 2, kind: output, shape index: {}]  }
   0x1   :  { %v12_v0 = vld [vmem:[%s141_s0] sm:$0xff] }
   0x2   :  { %7 = vsyncpa [#allocation3], 0  ;;  %v15_v1 = vsel %vm14_vm0, %v12_v0, -inf  ;;  %v103_v2 = vmov 0   ;;  %v13_v3 = vld [vmem:[%s142_s1] sm:$0xff]  ;;  %v19_v7 = vlaneseq  ;;  %s104_s0 = smov [#allocation2]  }
   0x3   :  { %72 = vset.pattern.permute.xlu0 %v103_v2  ;;  %s62_s1 = sshll.u32 %s104_s0, 4  ;;  %s63_s1 = int_to_ptr.vmem [resolvable:$true] %s62_s1 }
   0x4   :  { %16 = vmax.xlane.f32.xlu0 %v15_v1  ;;  %v20_v8 = vand.u32 127, %v19_v7  ;;  %v50_v27 = vshrl.u32 %v19_v7, 7  ;;  %s79_s13 = scalar_lea.vmem %s63_s1, 128  ;;  %p84_p1 = scmp.lt.s32.totalorder %s63_s1, %s63_s1 }
   0x5   :  { %p80_p0 = scmp.ne.s32.totalorder %s63_s1, %s79_s13  ;;  %p85_p2 = scmp.lt.s32.totalorder %s79_s13, %s79_s13 }
   0x6   :  { %vm51_vm2 = vcmp.eq.s32.totalorder %v50_v27, 0  ;;  %vm52_vm3 = vcmp.eq.s32.totalorder %v20_v8, 0 }
   0x7   :  { %vm53_vm4 = vmand %vm51_vm2, %vm52_vm3  ;;  %p86_p3 = por %p85_p2, %p84_p1 }
   0x9   :  { %p87_p4 = pnand %p86_p3, %p80_p0 }
  0x1a   :  { %22 = vperm.xlu0 %72, %v13_v3  }
  0x91   :  { %v17_v4 = vpop.xlane.xlu0 %16 }
  0x92   :  { %v18_v5 = vsub.f32 %v12_v0, %v17_v4 }
  0x94   :  { %v29_v6 = vmul.f32 1.442695, %v18_v5 }
  0x96   :  { %73 = vpow2.f32 %v29_v6 }
  0x99   :  { %v23_v9 = vpop.permute.xlu0 %22 }
  0x9a   :  { %vm24_vm1 = vcmp.eq.s32.totalorder %v20_v8, %v23_v9 }
  0x9b   :  { %v25_v12 = vsel %vm24_vm1, %v18_v5, 0.0 }
  0x9c   :  { %v26_v13 = vsel %vm14_vm0, %v25_v12, 0.0 }
  0xa0   :  { %v74_v10 = vpop.eup %73 }
  0xa1   :  { %v31_v11 = vsel %vm14_vm0, %v74_v10, 0.0 }
  0xa2   :  { %32 = vadd.xlane.f32.xlu1 %v31_v11 }
  0xa6   :  { %27 = vadd.xlane.f32.xlu1 %v26_v13 }
 0x12f   :  { %v33_v14 = vpop.xlane.xlu1 %32 }
 0x130   :  { %75 = vlog2.f32 %v33_v14 }
 0x133   :  { %v28_v17 = vpop.xlane.xlu1 %27 }
 0x13a   :  { %v76_v15 = vpop.eup %75 }
 0x13b   :  { %v35_v16 = vmul.f32 0.6931472, %v76_v15 }
 0x13d   :  { %v36_v18 = vsub.f32 %v35_v16, %v28_v17 }
 0x13f   :  { %v37_v19 = vsub.f32 0.0, %v36_v18 }
 0x141   :  { %v38_v20 = vmul.f32 1.442695, %v37_v19 }
 0x143   :  { %77 = vpow2.f32 %v38_v20 }
 0x14d   :  { %v78_v21 = vpop.eup %77 }
 0x14e   :  { %v40_v22 = vsub.f32 1.0, %v78_v21 }
 0x150   :  { %v41_v23 = vmul.f32 %v40_v22, %v40_v22 }
 0x152   :  { %v42_v24 = vmul.f32 %v41_v23, %v36_v18 }
 0x154   :  { %v43_v25 = vrot.slane %v42_v24, 4 }
 0x156   :  { %v44_v26 = vadd.f32 %v43_v25, %v42_v24 }
 0x158   :  { %v45_v28 = vrot.slane %v44_v26, 2 }
 0x15a   :  { %v46_v29 = vadd.f32 %v45_v28, %v44_v26 }
 0x15c   :  { %v47_v30 = vrot.slane %v46_v29, 1 }
 0x15e   :  { %v48_v31 = vadd.f32 %v47_v30, %v46_v29 }
 0x160   :  { %v54_v32 = vsel %vm53_vm4, %v48_v31, 0.0 }
 0x161   :  { %55 = vst [vmem:[#allocation2] sm:$0xff] %v54_v32 }
 0x162   :  { %90 = shalt.err (!%p87_p4)
}
 0x163   :  { %s91_s16 = scalar_lea.hbm %s143_s2, 128 }
 0x164   :  { %p92_p5 = scmp.ne.s32.totalorder %s143_s2, %s91_s16  ;;  %p95_p6 = scmp.lt.u32.totalorder %s91_s16, %s143_s2 }
 0x166   :  { %p97_p7 = pnand %p95_p6, %p92_p5 }
 0x168   :  { %100 = shalt.err (!%p97_p7)
}
 0x169   :  { %65 = dma.vmem_to_hbm [thread:$0]  %s63_s1, 128, %s143_s2, [#allocation3]  }
 0x16a   :  { %101 = dma.done.wait [#allocation3], 128  }
 0x16b   :  { %102 = vsyncadd [#allocation3], 4294967168 }
 0x16c   :  { %69 = vsyncpa [#allocation3], 1 }

</bundles_post_ra>
